<compile_context>
chip_gen: v5e
topology: v5e:2x2
jax: 0.10.0
libtpu: 0.0.40
codegen_flags: <defaults>
</compile_context>

<pallas_src>
import math

import jax
import jax.numpy as jnp
from jax import lax
from jax.experimental import pallas as pl
from jax.experimental.pallas import tpu as pltpu

_EPS = 1e-12  # torch.nn.functional.normalize default eps


def _round_up(a, b):
    return ((a + b - 1) // b) * b


def _cosine_kernel(x_ref, wt_ref, ix_ref, iw_ref, o_ref):
    """raw = x @ w.T accumulated straight into the f32 output block; the
    precomputed 1/||row|| (ix) and 1/||col|| (iw) factors are applied once on
    the last K step."""
    k = pl.program_id(2)

    @pl.when(k == 0)
    def _():
        o_ref[...] = jnp.zeros_like(o_ref)

    # Plain (tm, tk) @ (tk, tn) dot — weight was pre-transposed in the wrapper,
    # so no per-step transpose competes with MXU pushes.
    o_ref[...] += jnp.dot(x_ref[...], wt_ref[...],
                          preferred_element_type=jnp.float32)

    @pl.when(k == pl.num_programs(2) - 1)
    def _():
        # ix: (tm, 1), iw: (1, tn) — iw already lane-major, no relayout needed.
        o_ref[...] = o_ref[...] * ix_ref[...] * iw_ref[...]


def norm_forward(x, weight, label=None, *, tm_max=512, tn_max=512, tk_max=512):
    """Pallas equivalent of Norm.forward (cosine only; `label` is unused)."""
    del label  # dead code in the PyTorch module: the one-hot never feeds cosine

    B, D = x.shape
    C, D_w = weight.shape
    assert D == D_w

    # ---- tile selection: (8,128)-legal, lane-dense output, never oversize ----
    if B < 8:
        tm = B                                  # block == full dim -> legal
    else:
        tm = min(tm_max, 8 * (B // 8))
    if C < 128:
        tn = C                                  # block == full dim -> legal
    else:
        tn = min(tn_max, 128 * (C // 128))
    tk = min(tk_max, _round_up(D, 128))
    Dp = _round_up(D, tk)

    # v7x megacore: ensure >=2 blocks along a parallel axis when the shape
    # allows it, so both TensorCores get work.
    if pl.cdiv(B, tm) * pl.cdiv(C, tn) == 1:
        if tn >= 256:
            tn //= 2
        elif tm >= 16 and tm % 16 == 0:
            tm //= 2

    gi, gj, gk = pl.cdiv(B, tm), pl.cdiv(C, tn), Dp // tk
    grid = (gi, gj, gk)

    # ---- hoisted normalization factors (one cheap mem-bound XLA pass) ----
    # 1/max(||v||, eps) == rsqrt(max(sumsq, eps^2))
    xs = jnp.sum(jnp.square(x.astype(jnp.float32)), axis=1, keepdims=True)
    ws = jnp.sum(jnp.square(weight.astype(jnp.float32)), axis=1)
    inv_x = lax.rsqrt(jnp.maximum(xs, _EPS * _EPS))            # (B, 1) f32
    inv_w = lax.rsqrt(jnp.maximum(ws, _EPS * _EPS))[None, :]   # (1, C) f32

    # ---- operand prep: only the contraction (D) tail needs true zeros; the
    # zeros change neither the dot products nor the (already computed) norms.
    if Dp != D:
        x = jnp.pad(x, ((0, 0), (0, Dp - D)))
    wt = weight.T                               # one-time transpose (fused w/ pad)
    if Dp != D:
        wt = jnp.pad(wt, ((0, Dp - D), (0, 0)))

    itemsize = jnp.dtype(x.dtype).itemsize
    cost = pl.CostEstimate(
        flops=2 * B * C * Dp,
        transcendentals=0,
        bytes_accessed=(gj * B * Dp * itemsize      # x streamed once per j tile
                        + gi * Dp * C * itemsize    # w streamed once per i tile
                        + B * C * 4                 # f32 cosine writeback
                        + (B + C) * 4),             # inv_x / inv_w
    )

    # Scoped-VMEM request: enough for the largest tiles even on v5e's 16 MiB
    # scoped default, still well under v7x's 64 MiB physical VMEM.
    vmem_need = (2 * tm * tk * itemsize + 3 * tk * tn * itemsize
                 + 2 * tm * tn * 4 + 2 * (tm + tn) * 4)
    vmem_limit = int(min(max(2 * vmem_need, 32 << 20), 64 << 20))

    w_idx = lambda i, j, k: (k, j)
    if gi * gj * gk >= 3:
        # Deeper buffering on the streamed weight hides DMA jitter in the
        # small-B (weight-stream memory-bound) regime.
        try:
            w_spec = pl.BlockSpec((tk, tn), w_idx, pipeline_mode=pl.Buffered(3))
        except Exception:  # older jax without pipeline_mode: plain double buffer
            w_spec = pl.BlockSpec((tk, tn), w_idx)
    else:
        w_spec = pl.BlockSpec((tk, tn), w_idx)

    # Output stays f32 (accumulate-into-output needs it); matches the PyTorch
    # module for f32 inputs. For bf16 inputs the cosine is still emitted in f32.
    out = pl.pallas_call(
        _cosine_kernel,
        out_shape=jax.ShapeDtypeStruct((B, C), jnp.float32),
        grid_spec=pltpu.PrefetchScalarGridSpec(
            num_scalar_prefetch=0,
            grid=grid,
            in_specs=[
                pl.BlockSpec((tm, tk), lambda i, j, k: (i, k)),   # x tile
                w_spec,                                           # w.T tile
                pl.BlockSpec((tm, 1), lambda i, j, k: (i, 0)),    # inv_x
                pl.BlockSpec((1, tn), lambda i, j, k: (0, j)),    # inv_w
            ],
            out_specs=pl.BlockSpec((tm, tn), lambda i, j, k: (i, j)),
        ),
        compiler_params=pltpu.CompilerParams(
            dimension_semantics=("parallel", "parallel", "arbitrary"),
            vmem_limit_bytes=vmem_limit,
        ),
        cost_estimate=cost,
    )(x, wt, inv_x, inv_w)

    return out


def xavier_uniform(key, out_features, in_features):
    # matches nn.init.xavier_uniform_ (gain=1): U(-a, a), a = sqrt(6/(fan_in+fan_out))
    a = math.sqrt(6.0 / (in_features + out_features))
    return jax.random.uniform(
        key, (out_features, in_features), dtype=jnp.float32, minval=-a, maxval=a
    )


if __name__ == "__main__":
    key = jax.random.PRNGKey(0)
    k_x, k_w, k_l = jax.random.split(key, 3)

    B, in_features, out_features = 8, 32, 10

    x = jax.random.normal(k_x, (B, in_features), dtype=jnp.float32)
    weight = xavier_uniform(k_w, out_features, in_features)
    label = jax.random.randint(k_l, (B,), 0, 10)

    cosine = norm_forward(x, weight, label)
    cosine = jax.block_until_ready(cosine)

    # sanity: compare against plain-JAX reference of F.normalize + F.linear
    xn = x / jnp.maximum(jnp.linalg.norm(x, axis=1, keepdims=True), _EPS)
    wn = weight / jnp.maximum(jnp.linalg.norm(weight, axis=1, keepdims=True), _EPS)
    ref = xn @ wn.T
    assert cosine.shape == (B, out_features)
    assert jnp.allclose(cosine, ref, atol=1e-5), "mismatch vs reference"

    print("KERNEL_OK")
</pallas_src>

<mosaic_0001>
module attributes {stable_mosaic.version = 11 : i64} {
  func.func @_cosine_kernel(%arg0: i32, %arg1: i32, %arg2: i32, %arg3: memref<8x128xf32, #tpu.memory_space<vmem>>, %arg4: memref<128x10xf32, #tpu.memory_space<vmem>>, %arg5: memref<8x1xf32, #tpu.memory_space<vmem>>, %arg6: memref<1x10xf32, #tpu.memory_space<vmem>>, %arg7: memref<8x10xf32, #tpu.memory_space<vmem>>) attributes {dimension_semantics = [#tpu.dimension_semantics<parallel>, #tpu.dimension_semantics<parallel>, #tpu.dimension_semantics<arbitrary>], iteration_bounds = array<i64: 1, 1, 1>, scalar_prefetch = 0 : i64, scratch_operands = 0 : i64, tpu.core_type = #tpu.core_type<tc>, window_params = [{transform_indices = @transform_0, window_bounds = array<i64: 8, 128>}, {transform_indices = @transform_1, window_bounds = array<i64: 128, 10>}, {transform_indices = @transform_2, window_bounds = array<i64: 8, 1>}, {transform_indices = @transform_3, window_bounds = array<i64: 1, 10>}, {transform_indices = @transform_4, window_bounds = array<i64: 8, 10>}]} {
    %c0_i32 = arith.constant 0 : i32
    %0 = arith.cmpi eq, %arg2, %c0_i32 : i32
    %1 = arith.extui %0 : i1 to i32
    %c0_i32_0 = arith.constant 0 : i32
    %2 = arith.cmpi ne, %1, %c0_i32_0 : i32
    scf.if %2 {
      %cst_10 = arith.constant 0.000000e+00 : f32
      %12 = vector.broadcast %cst_10 : f32 to vector<8x10xf32>
      %c0_11 = arith.constant 0 : index
      %c0_12 = arith.constant 0 : index
      %13 = vector.load %arg7[%c0_11, %c0_12] : memref<8x10xf32, #tpu.memory_space<vmem>>, vector<8x10xf32>
      tpu.vector_store %arg7[%c0_11, %c0_12], %12 {strides = array<i32>} : memref<8x10xf32, #tpu.memory_space<vmem>>, vector<8x10xf32>,
    } else {
    }
    %c0 = arith.constant 0 : index
    %c0_1 = arith.constant 0 : index
    %3 = vector.load %arg7[%c0, %c0_1] : memref<8x10xf32, #tpu.memory_space<vmem>>, vector<8x10xf32>
    %c0_2 = arith.constant 0 : index
    %c0_3 = arith.constant 0 : index
    %4 = vector.load %arg3[%c0_2, %c0_3] : memref<8x128xf32, #tpu.memory_space<vmem>>, vector<8x128xf32>
    %c0_4 = arith.constant 0 : index
    %c0_5 = arith.constant 0 : index
    %5 = vector.load %arg4[%c0_4, %c0_5] : memref<128x10xf32, #tpu.memory_space<vmem>>, vector<128x10xf32>
    %cst = arith.constant dense<0.000000e+00> : vector<8x10xf32>
    %6 = tpu.matmul %4, %5, %cst {dimension_numbers = #tpu.dot_dimension_numbers<[1], [0], [0], [1], [0, 0, 1, 1], [], []>} : vector<8x128xf32>, vector<128x10xf32>, vector<8x10xf32> -> vector<8x10xf32>
    %7 = arith.addf %3, %6 : vector<8x10xf32>
    %c0_6 = arith.constant 0 : index
    %c0_7 = arith.constant 0 : index
    %8 = vector.load %arg7[%c0_6, %c0_7] : memref<8x10xf32, #tpu.memory_space<vmem>>, vector<8x10xf32>
    tpu.vector_store %arg7[%c0_6, %c0_7], %7 {strides = array<i32>} : memref<8x10xf32, #tpu.memory_space<vmem>>, vector<8x10xf32>,
    %c0_i32_8 = arith.constant 0 : i32
    %9 = arith.cmpi eq, %arg2, %c0_i32_8 : i32
    %10 = arith.extui %9 : i1 to i32
    %c0_i32_9 = arith.constant 0 : i32
    %11 = arith.cmpi ne, %10, %c0_i32_9 : i32
    scf.if %11 {
      %c0_10 = arith.constant 0 : index
      %c0_11 = arith.constant 0 : index
      %12 = vector.load %arg7[%c0_10, %c0_11] : memref<8x10xf32, #tpu.memory_space<vmem>>, vector<8x10xf32>
      %c0_12 = arith.constant 0 : index
      %c0_13 = arith.constant 0 : index
      %13 = vector.load %arg5[%c0_12, %c0_13] : memref<8x1xf32, #tpu.memory_space<vmem>>, vector<8x1xf32>
      %14 = vector.broadcast %13 : vector<8x1xf32> to vector<8x10xf32>
      %15 = arith.mulf %12, %14 : vector<8x10xf32>
      %c0_14 = arith.constant 0 : index
      %c0_15 = arith.constant 0 : index
      %16 = vector.load %arg6[%c0_14, %c0_15] : memref<1x10xf32, #tpu.memory_space<vmem>>, vector<1x10xf32>
      %17 = vector.broadcast %16 : vector<1x10xf32> to vector<8x10xf32>
      %18 = arith.mulf %15, %17 : vector<8x10xf32>
      %c0_16 = arith.constant 0 : index
      %c0_17 = arith.constant 0 : index
      %19 = vector.load %arg7[%c0_16, %c0_17] : memref<8x10xf32, #tpu.memory_space<vmem>>, vector<8x10xf32>
      tpu.vector_store %arg7[%c0_16, %c0_17], %18 {strides = array<i32>} : memref<8x10xf32, #tpu.memory_space<vmem>>, vector<8x10xf32>,
    } else {
    }
    return
  }
  func.func @transform_0(%arg0: i32, %arg1: i32, %arg2: i32) -> (i32, i32) {
    %c0_i32 = arith.constant 0 : i32
    return %arg0, %arg2 : i32, i32
  }
  func.func @transform_1(%arg0: i32, %arg1: i32, %arg2: i32) -> (i32, i32) {
    %c0_i32 = arith.constant 0 : i32
    return %arg2, %arg1 : i32, i32
  }
  func.func @transform_2(%arg0: i32, %arg1: i32, %arg2: i32) -> (i32, i32) {
    %c0_i32 = arith.constant 0 : i32
    %c0_i32_0 = arith.constant 0 : i32
    return %arg0, %c0_i32 : i32, i32
  }
  func.func @transform_3(%arg0: i32, %arg1: i32, %arg2: i32) -> (i32, i32) {
    %c0_i32 = arith.constant 0 : i32
    %c0_i32_0 = arith.constant 0 : i32
    return %c0_i32, %arg1 : i32, i32
  }
  func.func @transform_4(%arg0: i32, %arg1: i32, %arg2: i32) -> (i32, i32) {
    %c0_i32 = arith.constant 0 : i32
    return %arg0, %arg1 : i32, i32
  }
}

</mosaic_0001>

<bundles_post_ra>
// kernel: tpu_custom_call.1
= control target key start
LH: loop header
LB: loop body
LE: loop exit
PB: predicated region body
PF: predicated region fallthrough
CT: control target
= control target key end

     0   :  { %vm22_vm0 = vcmask 80896   ;;  %v129_v2 = vmov 0   ;;  %v130_v3 = vmov 0.0   ;;  %s220_s0 = inlined_call_operand.vmem [shape: f32[8,128], index: 0, kind: input, shape index: {}]   ;;  %s221_s1 = inlined_call_operand.vmem [shape: f32[128,10], index: 1, kind: input, shape index: {}]   ;;  %s222_s2 = inlined_call_operand.vmem [shape: f32[8,1], index: 2, kind: input, shape index: {}]   ;;  %s223_s3 = inlined_call_operand.vmem [shape: f32[1,10], index: 3, kind: input, shape index: {}]   ;;  %s224_s4 = inlined_call_operand.hbm [shape: f32[8,10], index: 4, kind: output, shape index: {}]  }
   0x1   :  { %v41_v0 = vld [vmem:[%s221_s1 + $0x78] sm:$0xff]  ;;  %v40_v1 = vld [vmem:[%s221_s1 + $0x70] sm:$0xff]  ;;  %101 = vset.pattern.permute.xlu0 %v129_v2  ;;  %23 = vst.msk [vmem:[#allocation2] sm:$0xff] %vm22_vm0, %v130_v3  ;;  %v39_v4 = vld [vmem:[%s221_s1 + $0x68] sm:$0xff] }
   0x2   :  { %42 = vmatpush.msra.mxu0 %v41_v0  ;;  %v38_v5 = vld [vmem:[%s221_s1 + $0x60] sm:$0xff]  ;;  %v37_v7 = vld [vmem:[%s221_s1 + $0x58] sm:$0xff] }
   0x3   :  { %v69_v6 = vld [vmem:[%s222_s2] sm:$0xff] }
   0x4   :  { %43 = vmatpush.msra.mxu0 %v40_v1  ;;  %72 = vperm.xlu0 %101, %v69_v6  }
   0x6   :  { %44 = vmatpush.msra.mxu0 %v39_v4 }
   0x7   :  { %9 = vsyncpa [#allocation3], 0  ;;  %v36_v8 = vld [vmem:[%s221_s1 + $0x50] sm:$0xff]  ;;  %v35_v9 = vld [vmem:[%s221_s1 + $0x48] sm:$0xff]  ;;  %s131_s26 = smov [#allocation2]   ;;  %s89_s29 = sshll.u32 %s224_s4, 4  ;;  %s90_s29 = int_to_ptr.hbm [resolvable:$true] %s89_s29 }
   0x8   :  { %45 = vmatpush.msra.mxu0 %v38_v5  ;;  %v34_v10 = vld [vmem:[%s221_s1 + $0x40] sm:$0xff]  ;;  %v33_v11 = vld [vmem:[%s221_s1 + $0x38] sm:$0xff]  ;;  %v32_v12 = vld [vmem:[%s221_s1 + $0x30] sm:$0xff] }
   0x9   :  { %v31_v13 = vld [vmem:[%s221_s1 + $0x28] sm:$0xff]  ;;  %v30_v14 = vld [vmem:[%s221_s1 + $0x20] sm:$0xff]  ;;  %v29_v15 = vld [vmem:[%s221_s1 + $0x18] sm:$0xff] }
   0xa   :  { %46 = vmatpush.msra.mxu0 %v37_v7  ;;  %v28_v16 = vld [vmem:[%s221_s1 + $0x10] sm:$0xff]  ;;  %v27_v17 = vld [vmem:[%s221_s1 + $0x8] sm:$0xff]  ;;  %v26_v18 = vld [vmem:[%s221_s1] sm:$0xff]  ;;  %s87_s1 = sshll.u32 %s131_s26, 4  ;;  %s88_s1 = int_to_ptr.vmem [resolvable:$true] %s87_s1 }
   0xb   :  { %v25_v19 = vld [vmem:[%s220_s0] sm:$0xff] }
   0xc   :  { %47 = vmatpush.msra.mxu0 %v36_v8  ;;  %v24_v20 = vld [vmem:[#allocation2] sm:$0xff] }
   0xd   :  { %v102_v24 = vld [vmem:[%s223_s3] ss:$0 sm:$0xff] }
   0xe   :  { %48 = vmatpush.msra.mxu0 %v35_v9 }
  0x10   :  { %49 = vmatpush.msra.mxu0 %v34_v10 }
  0x12   :  { %50 = vmatpush.msra.mxu0 %v33_v11 }
  0x14   :  { %51 = vmatpush.msra.mxu0 %v32_v12 }
  0x16   :  { %52 = vmatpush.msra.mxu0 %v31_v13 }
  0x18   :  { %53 = vmatpush.msra.mxu0 %v30_v14 }
  0x1a   :  { %54 = vmatpush.msra.mxu0 %v29_v15 }
  0x1c   :  { %55 = vmatpush.msra.mxu0 %v28_v16 }
  0x1e   :  { %56 = vmatpush.msra.mxu0 %v27_v17 }
  0x20   :  { %57 = vmatpush.msra.mxu0 %v26_v18 }
  0x21   :  { %58 = vmatmul.f32.vlgmr.msra.gmra.mxu0 %v25_v19 }
  0x76   :  { %v73_v23 = vpop.permute.xlu0 %72 }
  0x9e   :  { %v59_v21 = vpop.f32.mrf.mxu0 }
  0x9f   :  { %v62_v22 = vadd.f32 %v59_v21, %v24_v20 }
  0xa1   :  { %64 = vst.msk [vmem:[#allocation2] sm:$0xff] %vm22_vm0, %v62_v22 }
  0xa8   :  { %v68_v25 = vld [vmem:[#allocation2] sm:$0xff] }
  0xa9   :  { %v75_v26 = vmul.f32 %v73_v23, %v68_v25 }
  0xab   :  { %v80_v27 = vmul.f32 %v102_v24, %v75_v26 }
  0xad   :  { %81 = vst.msk [vmem:[#allocation2] sm:$0xff] %vm22_vm0, %v80_v27 }
  0xae   :  { %92 = dma.vmem_to_hbm [thread:$0]  %s88_s1, 128, %s90_s29, [#allocation3]  }
  0xaf   :  { %127 = dma.done.wait [#allocation3], 128  }
  0xb0   :  { %128 = vsyncadd [#allocation3], 4294967168 }
  0xb1   :  { %97 = vsyncpa [#allocation3], 1 }

</bundles_post_ra>
